<compile_context>
chip_gen: v7x
topology: tpu7x:2x2x1
jax: 0.10.0
libtpu: 0.0.40
codegen_flags: <defaults>
</compile_context>

<pallas_src>
import functools

import numpy as np
import jax
import jax.numpy as jnp
from jax import lax
from jax.experimental import pallas as pl
from jax.experimental.pallas import tpu as pltpu


_SUB = 256  # lane width of the in-kernel strip-mine sub-slice (multiple of 128)


# ---------------------------------------------------------------------------
# Pallas kernel: per-pose partial sums of masked reprojection error.
# ---------------------------------------------------------------------------
def _reproj_kernel(pose_ref, data_ref, out_ref, *, n_sub, sub):
    """pose_ref: (NPOSE, 16) f32 folded projection table per pose:
         [0:3] P0=fx*R0+cx*R2  [3] p0t=fx*tx+cx*tz
         [4:7] P1=fy*R1+cy*R2  [7] p1t=fy*ty+cy*tz
         [8:11] P2=R2          [11] p2t=tz            [12:16] padding
       data_ref: (6, TILE) f32 feature-major points: rows 0..2 XYZ, 3..4 obs uv, 5 mask.
       out_ref : (1, NPOSE, 1) f32 resident accumulator (one megacore partial)."""
    c = pl.program_id(1)

    @pl.when(c == 0)
    def _init():
        out_ref[...] = jnp.zeros_like(out_ref)

    npose = pose_ref.shape[0]

    # Pose columns (NPOSE, 1): hoisted out of the strip-mine loop, broadcast against
    # (1, SUB) point rows on the VPU.
    A0 = pose_ref[:, 0:1];  A1 = pose_ref[:, 1:2];  A2 = pose_ref[:, 2:3];   A3 = pose_ref[:, 3:4]
    B0 = pose_ref[:, 4:5];  B1 = pose_ref[:, 5:6];  B2 = pose_ref[:, 6:7];   B3 = pose_ref[:, 7:8]
    C0 = pose_ref[:, 8:9];  C1 = pose_ref[:, 9:10]; C2 = pose_ref[:, 10:11]; C3 = pose_ref[:, 11:12]

    def sub_body(i, acc):
        start = pl.multiple_of(i * sub, sub)
        x = data_ref[0:1, pl.ds(start, sub)]
        y = data_ref[1:2, pl.ds(start, sub)]
        z = data_ref[2:3, pl.ds(start, sub)]
        qu = data_ref[3:4, pl.ds(start, sub)]
        qv = data_ref[4:5, pl.ds(start, sub)]
        mask = data_ref[5:6, pl.ds(start, sub)]

        # Intrinsics folded into the pose table: u = u_num/zc, v = v_num/zc.
        u_num = A0 * x + A1 * y + A2 * z + A3          # (NPOSE, SUB)
        v_num = B0 * x + B1 * y + B2 * z + B3
        zc = C0 * x + C1 * y + C2 * z + C3

        # Guard unselected/padded lanes before the reciprocal, then EUP approx
        # reciprocal + one Newton step (~exact-divide parity in f32).
        zc_safe = jnp.where(mask > 0.0, zc, 1.0)
        inv0 = pl.reciprocal(zc_safe, approx=True)
        inv_z = inv0 * (2.0 - zc_safe * inv0)

        du = u_num * inv_z - qu
        dv = v_num * inv_z - qv
        err = jnp.sqrt(du * du + dv * dv) * mask       # multiply-mask: all lanes finite
        return acc + jnp.sum(err, axis=-1, keepdims=True)

    acc = lax.fori_loop(0, n_sub, sub_body,
                        jnp.zeros((npose, 1), jnp.float32), unroll=True)
    out_ref[0, :, :] += acc


def reproj_error_sums(poses, data, tile_np, *, sub=_SUB):
    """poses: (NPOSE, 16) f32, data: (6, NP) f32 with NP % (2*tile_np) == 0.
    Returns (2, NPOSE, 1) f32 per-core partial sums of masked reprojection error."""
    npose = poses.shape[0]
    np_total = data.shape[1]
    assert tile_np % sub == 0 and np_total % (2 * tile_np) == 0
    chunks_per_core = np_total // (2 * tile_np)
    kernel = functools.partial(_reproj_kernel, n_sub=tile_np // sub, sub=sub)
    return pl.pallas_call(
        kernel,
        out_shape=jax.ShapeDtypeStruct((2, npose, 1), jnp.float32),
        grid=(2, chunks_per_core),
        in_specs=[
            pl.BlockSpec((npose, 16), lambda p, c: (0, 0)),   # tiny pose table
            pl.BlockSpec((6, tile_np),                        # feature-major slab chunk
                         lambda p, c: (0, p * chunks_per_core + c)),
        ],
        out_specs=pl.BlockSpec((1, npose, 1), lambda p, c: (p, 0, 0)),
        compiler_params=pltpu.CompilerParams(
            dimension_semantics=("parallel", "arbitrary")),   # megacore split on v7x
    )(poses, data)


# ---------------------------------------------------------------------------
# Device-side packing + loss combination (jitted; no NumPy round trips).
# ---------------------------------------------------------------------------
def _pack_point_slab(r_3d, q_2d, mask_f, np_total):
    """Feature-major (6, NP) slab via one fused concatenate + one pad."""
    m = r_3d.shape[0]
    slab = jnp.concatenate(
        [r_3d.T.astype(jnp.float32),
         q_2d.T.astype(jnp.float32),
         mask_f[None, :].astype(jnp.float32)], axis=0)        # (6, m)
    return jnp.pad(slab, ((0, 0), (0, np_total - m)))


def _pack_pose_table(R_all, t_all, intr, npose_pad):
    """Fold K (row 2 = [0,0,1]) into each pose: u = (P0.X + p0t)/zc, v = (P1.X + p1t)/zc."""
    p = R_all.shape[0]
    fx, fy, cx, cy = intr[0], intr[1], intr[2], intr[3]
    P0 = fx * R_all[:, 0, :] + cx * R_all[:, 2, :]            # (p, 3)
    P1 = fy * R_all[:, 1, :] + cy * R_all[:, 2, :]
    P2 = R_all[:, 2, :]
    p0t = fx * t_all[:, 0] + cx * t_all[:, 2]
    p1t = fy * t_all[:, 1] + cy * t_all[:, 2]
    p2t = t_all[:, 2]
    rows = jnp.concatenate(
        [P0, p0t[:, None], P1, p1t[:, None], P2, p2t[:, None],
         jnp.zeros((p, 4), jnp.float32)], axis=1).astype(jnp.float32)   # (p, 16)
    pad = npose_pad - p
    # pad with copies of the reference pose; padded rows give finite values we slice off.
    return jnp.concatenate([rows, jnp.broadcast_to(rows[0:1], (pad, 16))], axis=0)


@functools.partial(jax.jit,
                   static_argnames=("pt_sel_thres", "pnp_failure_weight", "tile_np"))
def _pnp_losses_device(r_xyz, pt_sel_dist, q_uv, q_Tcw, q_K, r_obs3d, sel_matches,
                       pert_R, pert_t, sample_idx, success_mask,
                       *, pt_sel_thres, pnp_failure_weight, tile_np):
    q_pos_2d = q_uv.reshape(-1, 2)
    idx3d = r_obs3d[sel_matches[:, 1]]
    alpha_all = pt_sel_dist[idx3d]                        # pt_sel_dist[r_obs3d][sel_matches[:,1]]
    mask_f = (alpha_all > pt_sel_thres).astype(jnp.float32)
    r_3d = r_xyz[idx3d]
    q_2d = q_pos_2d[sel_matches[:, 0]]

    m = r_3d.shape[0]
    np_total = ((m + 2 * tile_np - 1) // (2 * tile_np)) * (2 * tile_np)
    data = _pack_point_slab(r_3d, q_2d, mask_f, np_total)

    # Pose table: row 0 = reference pose, rows 1.. = emulated "solved" poses.
    R0 = q_Tcw[:3, :3]
    t0 = q_Tcw[:3, 3]
    Rs = jnp.einsum("sij,jk->sik", pert_R, R0)
    ts = t0[None, :] + pert_t
    R_all = jnp.concatenate([R0[None], Rs], axis=0)
    t_all = jnp.concatenate([t0[None], ts], axis=0)
    intr = jnp.stack([q_K[0, 0], q_K[1, 1], q_K[0, 2], q_K[1, 2]])
    num_poses = R_all.shape[0]
    npose_pad = max(8, ((num_poses + 7) // 8) * 8)
    poses = _pack_pose_table(R_all, t_all, intr, npose_pad)

    # Pose-invariant reductions, hoisted out of the kernel (computed exactly once).
    n_sel = jnp.sum(mask_f)
    inv_n = 1.0 / n_sel
    prod_alpha = jnp.prod(jnp.where(mask_f > 0.0, alpha_all, 1.0))   # torch.prod(selected)
    sample_prods = jnp.prod(alpha_all[sample_idx], axis=1)           # (num_samples,)

    partials = reproj_error_sums(poses, data, tile_np)     # (2, npose_pad, 1)
    mean_err = jnp.sum(partials, axis=0)[:, 0] * inv_n     # (npose_pad,) masked means

    outliers_loss = mean_err[0] * prod_alpha
    reproj_loss = jnp.sum(mean_err[1:num_poses] * sample_prods * success_mask)
    pnp_failure_loss = jnp.sum(pnp_failure_weight * sample_prods * (1.0 - success_mask))
    return {"outliers_loss": outliers_loss,
            "reproj_loss": reproj_loss,
            "pnp_failure_loss": pnp_failure_loss}


# ---------------------------------------------------------------------------
# Host wrapper (mirrors RandomizedPnPLoss.forward for a single clip index).
# ---------------------------------------------------------------------------
def _rodrigues_np(rvec):
    rvec = np.asarray(rvec, np.float64)
    theta = float(np.linalg.norm(rvec))
    if theta < 1e-12:
        return np.eye(3, dtype=np.float32)
    k = rvec / theta
    Kx = np.array([[0.0, -k[2], k[1]],
                   [k[2], 0.0, -k[0]],
                   [-k[1], k[0], 0.0]])
    R = np.eye(3) + np.sin(theta) * Kx + (1.0 - np.cos(theta)) * (Kx @ Kx)
    return R.astype(np.float32)


def randomized_pnp_loss_forward(r_xyz, pt_sel_dist, q_uv, q_Tcw, q_K,
                                r_uv, r_obs3d, sel_matches,
                                pt_sel_thres=0.3, num_samples=5,
                                pnp_failure_weight=1.0, sample_seed=0):
    """JAX/Pallas port of RandomizedPnPLoss.forward (single clip index already selected)."""
    sel_matches = jnp.asarray(sel_matches)
    r_obs3d_flat = jnp.asarray(r_obs3d).reshape(-1)

    # TODO(synk): this device->host sync of the selection mask is unavoidable here because
    # the torch module's cv2.solvePnP / random.sample round trip is inherently host-side;
    # if run per-clip in a loop, batch clips into one call and keep the <4 early-out on device.
    idx3d = r_obs3d_flat[sel_matches[:, 1]]
    alpha_all = jnp.asarray(pt_sel_dist)[idx3d]
    qp_mask_2d = alpha_all > pt_sel_thres
    _ = jnp.asarray(r_uv).reshape(-1, 2)[sel_matches[:, 1]]  # r_2d_sel_qp: unused downstream
    mask_np = np.asarray(jax.device_get(qp_mask_2d))
    n_sel = int(mask_np.sum())
    if n_sel < 4:
        print("not enough points selected: {}".format(n_sel))
        z = jnp.zeros((), jnp.float32)
        return {"outliers_loss": z, "reproj_loss": z, "pnp_failure_loss": z}

    sel_idx = np.nonzero(mask_np)[0]
    rng = np.random.default_rng(sample_seed)
    sample_idx = np.zeros((num_samples, 3), np.int32)
    pert_R = np.zeros((num_samples, 3, 3), np.float32)
    pert_t = np.zeros((num_samples, 3), np.float32)
    success = np.ones((num_samples,), np.float32)
    for s in range(num_samples):
        pick = rng.choice(n_sel, size=3, replace=False)   # stands in for random.sample(range(n_sel), 3)
        sample_idx[s] = sel_idx[pick]
        # TODO(synk): cv2.solvePnP(SQPNP) + cv2.Rodrigues are host-side iterative solvers
        # with no Pallas/TPU equivalent; emulate each "solved" pose with a deterministic
        # small perturbation of the reference pose (the emulated solver always "succeeds").
        pert_R[s] = _rodrigues_np(rng.normal(scale=0.01, size=3))
        pert_t[s] = rng.normal(scale=0.01, size=3).astype(np.float32)

    # Lane-dense NP chunk (multiple of the in-kernel strip-mine width), capped at 2048 so
    # per-grid-step overhead is amortized while the strip-mined vreg set stays spill-free.
    m = int(sel_matches.shape[0])
    tile_np = min(2048, ((m + _SUB - 1) // _SUB) * _SUB)

    return _pnp_losses_device(
        jnp.asarray(r_xyz, jnp.float32), jnp.asarray(pt_sel_dist, jnp.float32),
        jnp.asarray(q_uv, jnp.float32), jnp.asarray(q_Tcw, jnp.float32),
        jnp.asarray(q_K, jnp.float32), r_obs3d_flat, sel_matches,
        jnp.asarray(pert_R), jnp.asarray(pert_t), jnp.asarray(sample_idx),
        jnp.asarray(success),
        pt_sel_thres=float(pt_sel_thres),
        pnp_failure_weight=float(pnp_failure_weight),
        tile_np=tile_np)


if __name__ == "__main__":
    key = jax.random.PRNGKey(0)
    k1, k2, k3, k4, k5, k6 = jax.random.split(key, 6)

    N3d = 64   # reference 3D points
    P = 64     # 2D observations / matches

    r_xyz = jnp.concatenate(
        [jax.random.uniform(k1, (N3d, 2), minval=-1.0, maxval=1.0),
         jax.random.uniform(k2, (N3d, 1), minval=4.0, maxval=8.0)], axis=1).astype(jnp.float32)
    pt_sel_dist = jax.random.uniform(k3, (N3d,), minval=0.05, maxval=1.0).astype(jnp.float32)
    r_obs3d = jax.random.permutation(k4, N3d)[:P].astype(jnp.int32)
    sel_matches = jnp.stack([jnp.arange(P, dtype=jnp.int32),
                             jnp.arange(P, dtype=jnp.int32)], axis=1)

    q_K = jnp.array([[200.0, 0.0, 64.0],
                     [0.0, 200.0, 64.0],
                     [0.0, 0.0, 1.0]], jnp.float32)
    Rgt = jnp.asarray(_rodrigues_np(np.array([0.02, -0.01, 0.03])), jnp.float32)
    tgt = jnp.array([0.1, -0.05, 0.2], jnp.float32)
    q_Tcw = jnp.concatenate([jnp.concatenate([Rgt, tgt[:, None]], axis=1),
                             jnp.array([[0.0, 0.0, 0.0, 1.0]], jnp.float32)], axis=0)

    # query 2D observations = noisy projections of the matched 3D points
    pts = r_xyz[r_obs3d]
    cam = pts @ Rgt.T + tgt
    uv = cam[:, :2] / cam[:, 2:3]
    q_uv = (uv * jnp.array([200.0, 200.0]) + jnp.array([64.0, 64.0])
            + 0.5 * jax.random.normal(k5, (P, 2))).astype(jnp.float32)
    r_uv = (jax.random.uniform(k6, (P, 2)) * 128.0).astype(jnp.float32)

    losses = randomized_pnp_loss_forward(
        r_xyz, pt_sel_dist, q_uv, q_Tcw, q_K, r_uv, r_obs3d, sel_matches,
        pt_sel_thres=0.3, num_samples=5, pnp_failure_weight=1.0, sample_seed=0)
    jax.block_until_ready(losses)
    print("KERNEL_OK")
</pallas_src>

<mosaic_0001>
module attributes {stable_mosaic.version = 11 : i64} {
  func.func @_reproj_kernel(%arg0: i32, %arg1: i32, %arg2: memref<8x16xf32, #tpu.memory_space<vmem>>, %arg3: memref<6x256xf32, #tpu.memory_space<vmem>>, %arg4: memref<1x8x1xf32, #tpu.memory_space<vmem>>) attributes {dimension_semantics = [#tpu.dimension_semantics<parallel>, #tpu.dimension_semantics<arbitrary>], iteration_bounds = array<i64: 2, 1>, scalar_prefetch = 0 : i64, scratch_operands = 0 : i64, tpu.core_type = #tpu.core_type<tc>, window_params = [{pipeline_mode = #tpu.pipeline_mode<synchronous>, transform_indices = @transform_0, window_bounds = array<i64: 8, 16>}, {transform_indices = @transform_1, window_bounds = array<i64: 6, 256>}, {transform_indices = @transform_2, window_bounds = array<i64: 1, 8, 1>}]} {
    %c0_i32 = arith.constant 0 : i32
    %0 = arith.cmpi eq, %arg1, %c0_i32 : i32
    %1 = arith.extui %0 : i1 to i32
    %c0_i32_0 = arith.constant 0 : i32
    %2 = arith.cmpi ne, %1, %c0_i32_0 : i32
    scf.if %2 {
      %cst_30 = arith.constant 0.000000e+00 : f32
      %101 = vector.broadcast %cst_30 : f32 to vector<1x8x1xf32>
      %c0_31 = arith.constant 0 : index
      %c0_32 = arith.constant 0 : index
      %c0_33 = arith.constant 0 : index
      %102 = vector.load %arg4[%c0_31, %c0_32, %c0_33] : memref<1x8x1xf32, #tpu.memory_space<vmem>>, vector<1x8x1xf32>
      tpu.vector_store %arg4[%c0_31, %c0_32, %c0_33], %101 {strides = array<i32>} : memref<1x8x1xf32, #tpu.memory_space<vmem>>, vector<1x8x1xf32>,
    } else {
    }
    %c0 = arith.constant 0 : index
    %c0_1 = arith.constant 0 : index
    %3 = vector.load %arg2[%c0, %c0_1] : memref<8x16xf32, #tpu.memory_space<vmem>>, vector<8x1xf32>
    %c0_2 = arith.constant 0 : index
    %c1 = arith.constant 1 : index
    %4 = vector.load %arg2[%c0_2, %c1] : memref<8x16xf32, #tpu.memory_space<vmem>>, vector<8x1xf32>
    %c0_3 = arith.constant 0 : index
    %c2 = arith.constant 2 : index
    %5 = vector.load %arg2[%c0_3, %c2] : memref<8x16xf32, #tpu.memory_space<vmem>>, vector<8x1xf32>
    %c0_4 = arith.constant 0 : index
    %c3 = arith.constant 3 : index
    %6 = vector.load %arg2[%c0_4, %c3] : memref<8x16xf32, #tpu.memory_space<vmem>>, vector<8x1xf32>
    %c0_5 = arith.constant 0 : index
    %c4 = arith.constant 4 : index
    %7 = vector.load %arg2[%c0_5, %c4] : memref<8x16xf32, #tpu.memory_space<vmem>>, vector<8x1xf32>
    %c0_6 = arith.constant 0 : index
    %c5 = arith.constant 5 : index
    %8 = vector.load %arg2[%c0_6, %c5] : memref<8x16xf32, #tpu.memory_space<vmem>>, vector<8x1xf32>
    %c0_7 = arith.constant 0 : index
    %c6 = arith.constant 6 : index
    %9 = vector.load %arg2[%c0_7, %c6] : memref<8x16xf32, #tpu.memory_space<vmem>>, vector<8x1xf32>
    %c0_8 = arith.constant 0 : index
    %c7 = arith.constant 7 : index
    %10 = vector.load %arg2[%c0_8, %c7] : memref<8x16xf32, #tpu.memory_space<vmem>>, vector<8x1xf32>
    %c0_9 = arith.constant 0 : index
    %c8 = arith.constant 8 : index
    %11 = vector.load %arg2[%c0_9, %c8] : memref<8x16xf32, #tpu.memory_space<vmem>>, vector<8x1xf32>
    %c0_10 = arith.constant 0 : index
    %c9 = arith.constant 9 : index
    %12 = vector.load %arg2[%c0_10, %c9] : memref<8x16xf32, #tpu.memory_space<vmem>>, vector<8x1xf32>
    %c0_11 = arith.constant 0 : index
    %c10 = arith.constant 10 : index
    %13 = vector.load %arg2[%c0_11, %c10] : memref<8x16xf32, #tpu.memory_space<vmem>>, vector<8x1xf32>
    %c0_12 = arith.constant 0 : index
    %c11 = arith.constant 11 : index
    %14 = vector.load %arg2[%c0_12, %c11] : memref<8x16xf32, #tpu.memory_space<vmem>>, vector<8x1xf32>
    %cst = arith.constant 0.000000e+00 : f32
    %15 = vector.broadcast %cst : f32 to vector<8x1xf32>
    %c0_i32_13 = arith.constant 0 : i32
    %c256_i32 = arith.constant 256 : i32
    %16 = arith.muli %c0_i32_13, %c256_i32 : i32
    %17 = tpu.assume_multiple %16, 256 : i32
    %c0_14 = arith.constant 0 : index
    %18 = arith.index_cast %17 : i32 to index
    %19 = vector.load %arg3[%c0_14, %18] : memref<6x256xf32, #tpu.memory_space<vmem>>, vector<1x256xf32>
    %c1_15 = arith.constant 1 : index
    %20 = arith.index_cast %17 : i32 to index
    %21 = vector.load %arg3[%c1_15, %20] : memref<6x256xf32, #tpu.memory_space<vmem>>, vector<1x256xf32>
    %c2_16 = arith.constant 2 : index
    %22 = arith.index_cast %17 : i32 to index
    %23 = vector.load %arg3[%c2_16, %22] : memref<6x256xf32, #tpu.memory_space<vmem>>, vector<1x256xf32>
    %c3_17 = arith.constant 3 : index
    %24 = arith.index_cast %17 : i32 to index
    %25 = vector.load %arg3[%c3_17, %24] : memref<6x256xf32, #tpu.memory_space<vmem>>, vector<1x256xf32>
    %c4_18 = arith.constant 4 : index
    %26 = arith.index_cast %17 : i32 to index
    %27 = vector.load %arg3[%c4_18, %26] : memref<6x256xf32, #tpu.memory_space<vmem>>, vector<1x256xf32>
    %c5_19 = arith.constant 5 : index
    %28 = arith.index_cast %17 : i32 to index
    %29 = vector.load %arg3[%c5_19, %28] : memref<6x256xf32, #tpu.memory_space<vmem>>, vector<1x256xf32>
    %30 = vector.broadcast %3 : vector<8x1xf32> to vector<8x256xf32>
    %31 = vector.broadcast %19 : vector<1x256xf32> to vector<8x256xf32>
    %32 = arith.mulf %30, %31 : vector<8x256xf32>
    %33 = vector.broadcast %4 : vector<8x1xf32> to vector<8x256xf32>
    %34 = vector.broadcast %21 : vector<1x256xf32> to vector<8x256xf32>
    %35 = arith.mulf %33, %34 : vector<8x256xf32>
    %36 = arith.addf %32, %35 : vector<8x256xf32>
    %37 = vector.broadcast %5 : vector<8x1xf32> to vector<8x256xf32>
    %38 = vector.broadcast %23 : vector<1x256xf32> to vector<8x256xf32>
    %39 = arith.mulf %37, %38 : vector<8x256xf32>
    %40 = arith.addf %36, %39 : vector<8x256xf32>
    %41 = vector.broadcast %6 : vector<8x1xf32> to vector<8x256xf32>
    %42 = arith.addf %40, %41 : vector<8x256xf32>
    %43 = vector.broadcast %7 : vector<8x1xf32> to vector<8x256xf32>
    %44 = vector.broadcast %19 : vector<1x256xf32> to vector<8x256xf32>
    %45 = arith.mulf %43, %44 : vector<8x256xf32>
    %46 = vector.broadcast %8 : vector<8x1xf32> to vector<8x256xf32>
    %47 = vector.broadcast %21 : vector<1x256xf32> to vector<8x256xf32>
    %48 = arith.mulf %46, %47 : vector<8x256xf32>
    %49 = arith.addf %45, %48 : vector<8x256xf32>
    %50 = vector.broadcast %9 : vector<8x1xf32> to vector<8x256xf32>
    %51 = vector.broadcast %23 : vector<1x256xf32> to vector<8x256xf32>
    %52 = arith.mulf %50, %51 : vector<8x256xf32>
    %53 = arith.addf %49, %52 : vector<8x256xf32>
    %54 = vector.broadcast %10 : vector<8x1xf32> to vector<8x256xf32>
    %55 = arith.addf %53, %54 : vector<8x256xf32>
    %56 = vector.broadcast %11 : vector<8x1xf32> to vector<8x256xf32>
    %57 = vector.broadcast %19 : vector<1x256xf32> to vector<8x256xf32>
    %58 = arith.mulf %56, %57 : vector<8x256xf32>
    %59 = vector.broadcast %12 : vector<8x1xf32> to vector<8x256xf32>
    %60 = vector.broadcast %21 : vector<1x256xf32> to vector<8x256xf32>
    %61 = arith.mulf %59, %60 : vector<8x256xf32>
    %62 = arith.addf %58, %61 : vector<8x256xf32>
    %63 = vector.broadcast %13 : vector<8x1xf32> to vector<8x256xf32>
    %64 = vector.broadcast %23 : vector<1x256xf32> to vector<8x256xf32>
    %65 = arith.mulf %63, %64 : vector<8x256xf32>
    %66 = arith.addf %62, %65 : vector<8x256xf32>
    %67 = vector.broadcast %14 : vector<8x1xf32> to vector<8x256xf32>
    %68 = arith.addf %66, %67 : vector<8x256xf32>
    %cst_20 = arith.constant 0.000000e+00 : f32
    %69 = vector.broadcast %cst_20 : f32 to vector<1x256xf32>
    %70 = arith.cmpf ogt, %29, %69 : vector<1x256xf32>
    %cst_21 = arith.constant 1.000000e+00 : f32
    %71 = vector.shape_cast %70 : vector<1x256xi1> to vector<1x256xi1>
    %72 = vector.broadcast %71 : vector<1x256xi1> to vector<8x256xi1>
    %73 = vector.broadcast %cst_21 : f32 to vector<8x256xf32>
    %74 = arith.select %72, %68, %73 : vector<8x256xi1>, vector<8x256xf32>
    %75 = tpu.reciprocal %74 {approx = true} : vector<8x256xf32> -> vector<8x256xf32>
    %76 = arith.mulf %74, %75 : vector<8x256xf32>
    %cst_22 = arith.constant 2.000000e+00 : f32
    %77 = vector.broadcast %cst_22 : f32 to vector<8x256xf32>
    %78 = arith.subf %77, %76 : vector<8x256xf32>
    %79 = arith.mulf %75, %78 : vector<8x256xf32>
    %80 = arith.mulf %42, %79 : vector<8x256xf32>
    %81 = vector.broadcast %25 : vector<1x256xf32> to vector<8x256xf32>
    %82 = arith.subf %80, %81 : vector<8x256xf32>
    %83 = arith.mulf %55, %79 : vector<8x256xf32>
    %84 = vector.broadcast %27 : vector<1x256xf32> to vector<8x256xf32>
    %85 = arith.subf %83, %84 : vector<8x256xf32>
    %86 = arith.mulf %82, %82 : vector<8x256xf32>
    %87 = arith.mulf %85, %85 : vector<8x256xf32>
    %88 = arith.addf %86, %87 : vector<8x256xf32>
    %89 = math.sqrt %88 : vector<8x256xf32>
    %90 = vector.broadcast %29 : vector<1x256xf32> to vector<8x256xf32>
    %91 = arith.mulf %89, %90 : vector<8x256xf32>
    %cst_23 = arith.constant dense<0.000000e+00> : vector<8xf32>
    %92 = vector.multi_reduction <add>, %91, %cst_23 [1] : vector<8x256xf32> to vector<8xf32>
    %93 = vector.shape_cast %92 : vector<8xf32> to vector<8x1xf32>
    %94 = arith.addf %15, %93 : vector<8x1xf32>
    %c1_i32 = arith.constant 1 : i32
    %c0_24 = arith.constant 0 : index
    %c0_25 = arith.constant 0 : index
    %c0_26 = arith.constant 0 : index
    %95 = vector.load %arg4[%c0_24, %c0_25, %c0_26] : memref<1x8x1xf32, #tpu.memory_space<vmem>>, vector<1x8x1xf32>
    %96 = vector.shape_cast %95 : vector<1x8x1xf32> to vector<8x1xf32>
    %97 = arith.addf %96, %94 : vector<8x1xf32>
    %c0_27 = arith.constant 0 : index
    %c0_28 = arith.constant 0 : index
    %c0_29 = arith.constant 0 : index
    %98 = vector.load %arg4[%c0_27, %c0_28, %c0_29] : memref<1x8x1xf32, #tpu.memory_space<vmem>>, vector<1x8x1xf32>
    %99 = vector.shape_cast %98 : vector<1x8x1xf32> to vector<8x1xf32>
    %100 = vector.shape_cast %97 : vector<8x1xf32> to vector<1x8x1xf32>
    tpu.vector_store %arg4[%c0_27, %c0_28, %c0_29], %100 {strides = array<i32>} : memref<1x8x1xf32, #tpu.memory_space<vmem>>, vector<1x8x1xf32>,
    return
  }
  func.func @transform_0(%arg0: i32, %arg1: i32) -> (i32, i32) {
    %c0_i32 = arith.constant 0 : i32
    %c0_i32_0 = arith.constant 0 : i32
    %c0_i32_1 = arith.constant 0 : i32
    return %c0_i32, %c0_i32_0 : i32, i32
  }
  func.func @transform_1(%arg0: i32, %arg1: i32) -> (i32, i32) {
    %c1_i32 = arith.constant 1 : i32
    %0 = arith.muli %arg0, %c1_i32 : i32
    %1 = arith.addi %0, %arg1 : i32
    %c0_i32 = arith.constant 0 : i32
    %c0_i32_0 = arith.constant 0 : i32
    return %c0_i32, %1 : i32, i32
  }
  func.func @transform_2(%arg0: i32, %arg1: i32) -> (i32, i32, i32) {
    %c0_i32 = arith.constant 0 : i32
    %c0_i32_0 = arith.constant 0 : i32
    %c0_i32_1 = arith.constant 0 : i32
    return %arg0, %c0_i32, %c0_i32_0 : i32, i32, i32
  }
}

</mosaic_0001>

<bundles_post_ra>
// kernel: _pnp_losses_device.1
= control target key start
LH: loop header
LB: loop body
LE: loop exit
PB: predicated region body
PF: predicated region fallthrough
CT: control target
= control target key end

     0   :  { %s578_s9 = smov 0   ;;  %s580_s10 = smov 0   ;;  %s657_s0 = inlined_call_operand.vmem [shape: f32[8,16], index: 0, kind: input, shape index: {}]   ;;  %s658_s1 = inlined_call_operand.vmem [shape: f32[6,512], index: 1, kind: input, shape index: {}]   ;;  %s659_s2 = inlined_call_operand.vmem [shape: f32[2,8,1], index: 2, kind: output, shape index: {}]  }
   0x1   :  { %s582_s11 = smov 0  }
   0x2 LB: > { %s24_s12 = sadd.s32 1, %s544_s10  ;;  %p457_p0 = scmp.ge.s32.totalorder %s548_s11, 1  ;;  %s548_s11 = sphi %s582_s11, %s12_s11   ;;  %s544_s10 = sphi %s580_s10, %s661_s10   ;;  %s540_s9 = sphi %s578_s9, %s660_s9  }
   0x3   : > { %p26_p1 = scmp.ge.s32.totalorder %s24_s12, 2  ;;  %p129_p2 = scmp.lt.s32.totalorder %s548_s11, 3 }
   0x5   : > { %s663_s12 = smov (%p26_p1, %s24_s12), 0  ;;  %p130_p3 = pnand %p457_p0, %p129_p2 }
   0x6   : > { %v169_v0 = vld [vmem:[%s657_s0] sm:$0xff] (!%p130_p3)  ;;  %v550_v1 = vmov (!%p130_p3), 10   ;;  %v551_v2 = vmov (!%p130_p3), 8   ;;  %v552_v3 = vmov (!%p130_p3), 11   ;;  %v553_v4 = vmov (!%p130_p3), 9   ;;  %p159_p4 = scmp.lt.s32.totalorder (!%p130_p3), %s540_s9, 1 }
   0x7   : > { %133 = sbr.rel (%p130_p3) target bundleno = 341 (0x155), region = 28  ;;  %507 = vset.pattern.permute.xlu1 (!%p130_p3), %v550_v1  ;;  %505 = vset.pattern.permute.xlu0 (!%p130_p3), %v551_v2  ;;  %v554_v5 = vmov (!%p130_p3), 0   ;;  %v555_v6 = vmov (!%p130_p3), 1   ;;  %v556_v7 = vmov (!%p130_p3), 4   ;;  %v557_v8 = vmov (!%p130_p3), 2   ;;  %s458_s20 = sshll.u32 (!%p130_p3), %s540_s9, 1 }
   0x8   : > { %286 = vperm.xlu1 (!%p130_p3), %507, %v169_v0   ;;  %272 = vperm.xlu0 (!%p130_p3), %505, %v169_v0   ;;  %v558_v9 = vmov (!%p130_p3), 5   ;;  %v559_v10 = vmov (!%p130_p3), 7   ;;  %v560_v11 = vmov (!%p130_p3), 6   ;;  %v561_v12 = vmov (!%p130_p3), 3   ;;  %p153_p5 = scmp.lt.s32.totalorder (!%p130_p3), %s458_s20, 3 }
   0x9   : > { %vm167_vm0 = vcmask (!%p130_p3), 7168   ;;  %v562_v13 = vmov (!%p130_p3), 0.0   ;;  %v187_v14 = vlaneseq (!%p130_p3) }
   0xb   : > { %v188_v15 = vshrl.u32 (!%p130_p3), %v187_v14, 7 }
   0xc   : > { %508 = vset.pattern.permute.xlu1 (!%p130_p3), %v552_v3  ;;  %506 = vset.pattern.permute.xlu0 (!%p130_p3), %v553_v4 }
   0xd   : > { %294 = vperm.xlu1 (!%p130_p3), %508, %v169_v0   ;;  %278 = vperm.xlu0 (!%p130_p3), %506, %v169_v0   ;;  %v616_v16 = vsub.s32 (!%p130_p3), 0, %v188_v15  ;;  %v618_v17 = vsub.s32 (!%p130_p3), 1, %v188_v15 }
   0xe   : > { %s160_s15 = scalar_select %p159_p4, %s540_s9, 1 }
   0xf   : > { %s665_s20 = smov (!%p153_p5, %s458_s20), 3 }
  0x10   : > { %s460_s16 = sshll.u32 %s160_s15, 3  ;;  %s459_s21 = sshll.u32 %s665_s20, 3 }
  0x11   : > { %509 = vset.pattern.permute.xlu1 %v554_v5  ;;  %510 = vset.pattern.permute.xlu0 %v555_v6  ;;  %s606_s19 = scalar_lea.vmem %s659_s2, %s460_s16  ;;  %s614_s24 = scalar_lea.vmem %s658_s1, %s459_s21 }
  0x12   : > { %183 = vperm.xlu1 %509, %v169_v0   ;;  %200 = vperm.xlu0 %510, %v169_v0   ;;  %168 = vst.msk [vmem:[%s606_s19] sm:$0xff] %vm167_vm0, %v562_v13  ;;  %v621_v18 = vld [vmem:[%s614_s24 + $0x5] ss:$8 sm:$0x3] }
  0x13   : > { %v170_v19 = vld [vmem:[%s614_s24] ss:$8 sm:$0x3]  ;;  %v461_v20 = vld [vmem:[%s614_s24 + $0x1] ss:$8 sm:$0x3] }
  0x14   : > { %vm299_vm1 = vcmp.gt.f32.partialorder %v621_v18, 0.0  ;;  %v462_v23 = vld [vmem:[%s614_s24 + $0x2] ss:$8 sm:$0x3]  ;;  %v190_v24 = vrot.slane %v170_v19, %v616_v16  ;;  %v194_v25 = vrot.slane %v170_v19, %v618_v17  ;;  %v207_v26 = vrot.slane %v461_v20, %v616_v16 }
  0x15   : > { %v211_v27 = vrot.slane %v461_v20, %v618_v17  ;;  %v300_v28 = vsel %vm299_vm1, 1, %v554_v5  ;;  %v226_v29 = vrot.slane %v462_v23, %v616_v16  ;;  %v230_v30 = vrot.slane %v462_v23, %v618_v17  ;;  %v464_v6 = vld [vmem:[%s614_s24 + $0x4] ss:$8 sm:$0x3] }
  0x16   : > { %511 = vset.pattern.permute.xlu1 %v556_v7  ;;  %513 = vset.pattern.permute.xlu0 %v557_v8  ;;  %v304_v37 = vrot.slane %v300_v28, %v616_v16  ;;  %v308_v38 = vrot.slane %v300_v28, %v618_v17  ;;  %v463_v19 = vld [vmem:[%s614_s24 + $0x3] ss:$8 sm:$0x3]  ;;  %v342_v20 = vrot.slane %v464_v6, %v616_v16 }
  0x17   : > { %244 = vperm.xlu1 %511, %v169_v0   ;;  %219 = vperm.xlu0 %513, %v169_v0  }
  0x18   : > { %vm309_vm2 = vcmp.eq.s32.totalorder %v304_v37, 1  ;;  %vm310_vm3 = vcmp.eq.s32.totalorder %v308_v38, 1 }
  0x1b   : > { %512 = vset.pattern.permute.xlu1 %v558_v9  ;;  %516 = vset.pattern.permute.xlu0 %v559_v10 }
  0x1c   : > { %250 = vperm.xlu1 %512, %v169_v0   ;;  %266 = vperm.xlu0 %516, %v169_v0  }
  0x20   : > { %514 = vset.pattern.permute.xlu1 %v560_v11  ;;  %517 = vset.pattern.permute.xlu0 %v552_v3 }
  0x21   : > { %258 = vperm.xlu1 %514, %v169_v0  }
  0x25   : > { %515 = vset.pattern.permute.xlu1 %v561_v12 }
  0x26   : > { %238 = vperm.xlu1 %515, %v169_v0  }
  0x87   : > { %v287_v21 = vpop.permute.xlu1 %286  ;;  %v273_v22 = vpop.permute.xlu0 %272 }
  0x88   : > { %v275_v33 = vmul.f32 %v273_v22, %v190_v24  ;;  %v276_v34 = vmul.f32 %v273_v22, %v194_v25  ;;  %v289_v39 = vmul.f32 %v287_v21, %v226_v29  ;;  %v290_v40 = vmul.f32 %v287_v21, %v230_v30 }
  0x8c   : > { %v295_v31 = vpop.permute.xlu1 %294  ;;  %v279_v32 = vpop.permute.xlu0 %278 }
  0x8d   : > { %v281_v35 = vmul.f32 %v279_v32, %v207_v26  ;;  %v282_v36 = vmul.f32 %v279_v32, %v211_v27 }
  0x8f   : > { %v283_v41 = vadd.f32 %v281_v35, %v275_v33  ;;  %v284_v42 = vadd.f32 %v282_v36, %v276_v34  ;;  %v346_v33 = vrot.slane %v464_v6, %v618_v17  ;;  %v331_v34 = vrot.slane %v463_v19, %v618_v17 }
  0x91   : > { %v291_v43 = vadd.f32 %v289_v39, %v283_v41  ;;  %v292_v44 = vadd.f32 %v290_v40, %v284_v42  ;;  %v184_v45 = vpop.permute.xlu1 %183  ;;  %v201_v51 = vpop.permute.xlu0 %200 }
  0x92   : > { %v197_v54 = vmul.f32 %v190_v24, %v184_v45  ;;  %v198_v57 = vmul.f32 %v194_v25, %v184_v45  ;;  %v214_v58 = vmul.f32 %v207_v26, %v201_v51  ;;  %v215_v59 = vmul.f32 %v211_v27, %v201_v51 }
  0x93   : > { %v297_v46 = vadd.f32 %v295_v31, %v291_v43  ;;  %v298_v47 = vadd.f32 %v295_v31, %v292_v44  ;;  %v375_v51 = vrot.slane %v621_v18, %v616_v16 }
  0x94   : > { %v216_v9 = vadd.f32 %v214_v58, %v197_v54  ;;  %v217_v10 = vadd.f32 %v215_v59, %v198_v57  ;;  %v379_v54 = vrot.slane %v621_v18, %v618_v17 }
  0x95   : > { %v311_v48 = vsel %vm309_vm2, %v297_v46, 1.0  ;;  %v312_v49 = vsel %vm310_vm3, %v298_v47, 1.0 }
  0x96   : > { %v245_v50 = vpop.permute.xlu1 %244  ;;  %518 = vrcp.f32 %v311_v48  ;;  %v220_v55 = vpop.permute.xlu0 %219 }
  0x97   : > { %520 = vrcp.f32 %v312_v49  ;;  %v247_v60 = vmul.f32 %v245_v50, %v190_v24  ;;  %v248_v61 = vmul.f32 %v245_v50, %v194_v25  ;;  %v233_v63 = vmul.f32 %v226_v29, %v220_v55 }
  0x98   : > { %v234_v0 = vmul.f32 %v230_v30, %v220_v55 }
  0x99   : > { %v235_v21 = vadd.f32 %v233_v63, %v216_v9 }
  0x9a   : > { %v236_v22 = vadd.f32 %v234_v0, %v217_v10 }
  0x9b   : > { %v251_v52 = vpop.permute.xlu1 %250  ;;  %v267_v11 = vpop.permute.xlu0 %266 }
  0x9c   : > { %v253_v53 = vmul.f32 %v251_v52, %v207_v26  ;;  %v254_v56 = vmul.f32 %v251_v52, %v211_v27 }
  0x9e   : > { %v255_v1 = vadd.f32 %v253_v53, %v247_v60  ;;  %v256_v3 = vadd.f32 %v254_v56, %v248_v61 }
  0xa0   : > { %v519_v62 = vpop.eup %518  ;;  %v259_v2 = vpop.permute.xlu1 %258 }
  0xa1   : > { %v261_v4 = vmul.f32 %v259_v2, %v226_v29  ;;  %v262_v5 = vmul.f32 %v259_v2, %v230_v30  ;;  %v315_v7 = vmul.f32 %v519_v62, %v311_v48  ;;  %v521_v8 = vpop.eup %520  ;;  %v327_v30 = vrot.slane %v463_v19, %v616_v16  ;;  %v388_v16 = vld [vmem:[%s606_s19] sm:$0xff] }
  0xa2   : > { %v316_v14 = vmul.f32 %v521_v8, %v312_v49 }
  0xa3   : > { %v263_v12 = vadd.f32 %v261_v4, %v255_v1  ;;  %v264_v13 = vadd.f32 %v262_v5, %v256_v3  ;;  %v317_v15 = vsub.f32 2.0, %v315_v7 }
  0xa4   : > { %v318_v25 = vsub.f32 2.0, %v316_v14 }
  0xa5   : > { %v269_v23 = vadd.f32 %v267_v11, %v263_v12  ;;  %v270_v24 = vadd.f32 %v267_v11, %v264_v13  ;;  %v319_v26 = vmul.f32 %v519_v62, %v317_v15  ;;  %v239_v27 = vpop.permute.xlu1 %238 }
  0xa6   : > { %v241_v28 = vadd.f32 %v239_v27, %v235_v21  ;;  %v242_v29 = vadd.f32 %v239_v27, %v236_v22  ;;  %v320_v31 = vmul.f32 %v521_v8, %v318_v25 }
  0xa7   : > { %v336_v32 = vmul.f32 %v319_v26, %v269_v23 }
  0xa8   : > { %v321_v35 = vmul.f32 %v319_v26, %v241_v28  ;;  %v337_v36 = vmul.f32 %v320_v31, %v270_v24  ;;  %v322_v38 = vmul.f32 %v320_v31, %v242_v29 }
  0xa9   : > { %v349_v37 = vsub.f32 %v336_v32, %v342_v20 }
  0xaa   : > { %v334_v39 = vsub.f32 %v321_v35, %v327_v30  ;;  %v350_v40 = vsub.f32 %v337_v36, %v346_v33  ;;  %v335_v42 = vsub.f32 %v322_v38, %v331_v34 }
  0xab   : > { %v353_v41 = vmul.f32 %v349_v37, %v349_v37 }
  0xac   : > { %v351_v43 = vmul.f32 %v334_v39, %v334_v39  ;;  %v354_v44 = vmul.f32 %v350_v40, %v350_v40  ;;  %v352_v45 = vmul.f32 %v335_v42, %v335_v42 }
  0xae   : > { %v355_v46 = vadd.f32 %v353_v41, %v351_v43  ;;  %v356_v47 = vadd.f32 %v354_v44, %v352_v45 }
  0xb0   : > { %522 = vrsqrt.f32 %v355_v46  ;;  %vm359_vm4 = vcmp.eq.f32.partialorder %v355_v46, inf  ;;  %v362_v52 = vand.u32 2147483648, %v355_v46  ;;  %vm361_vm5 = vcmp.eq.f32.partialorder %v355_v46, 0.0 }
  0xb1   : > { %524 = vrsqrt.f32 %v356_v47  ;;  %vm366_vm6 = vcmp.eq.f32.partialorder %v356_v47, inf  ;;  %v369_v56 = vand.u32 2147483648, %v356_v47  ;;  %vm368_vm7 = vcmp.eq.f32.partialorder %v356_v47, 0.0 }
  0xba   : > { %v523_v48 = vpop.eup %522 }
  0xbb   : > { %v525_v49 = vpop.eup %524  ;;  %v358_v50 = vmul.f32 %v523_v48, %v355_v46 }
  0xbc   : > { %v365_v53 = vmul.f32 %v525_v49, %v356_v47 }
  0xbd   : > { %v360_v55 = vsel %vm359_vm4, %v355_v46, %v358_v50 }
  0xbe   : > { %v363_v57 = vsel %vm361_vm5, %v362_v52, %v360_v55  ;;  %v367_v58 = vsel %vm366_vm6, %v356_v47, %v365_v53 }
  0xbf   : > { %v370_v59 = vsel %vm368_vm7, %v369_v56, %v367_v58  ;;  %v382_v60 = vmul.f32 %v375_v51, %v363_v57 }
  0xc0   : > { %v383_v61 = vmul.f32 %v379_v54, %v370_v59 }
  0xc2   : > { %v384_v62 = vadd.f32 %v383_v61, %v382_v60 }
  0xc4   : > { %385 = vadd.xlane.f32.xlu1 %v384_v62 }
 0x151   : > { %v386_v63 = vpop.xlane.xlu1 %385 }
 0x152   : > { %v389_v0 = vadd.f32 %v388_v16, %v386_v63 }
 0x154   : > { %391 = vst.msk [vmem:[%s606_s19] sm:$0xff] %vm167_vm0, %v389_v0 }
 0x155 PF: > { %s12_s11 = sadd.s32 1, %s548_s11   ;;  %s660_s9 = smov %s544_s10 }
 0x156   : > { %p9_p6 = scmp.ge.s32.totalorder %s12_s11, 4   ;;  %s661_s10 = smov %s663_s12 }
 0x158   :  { %11 = sbr.rel (!%p9_p6) target bundleno = 2 (0x2), region = 67 }

</bundles_post_ra>
